<compile_context>
chip_gen: v7x
topology: tpu7x:2x2x1
jax: 0.10.0
libtpu: 0.0.40
codegen_flags: <defaults>
</compile_context>

<pallas_src>
import jax
import jax.numpy as jnp
from jax.experimental import pallas as pl
from jax.experimental.pallas import tpu as pltpu

NEG_SLOPE = 0.01          # F.leaky_relu default
IN_FEATURES = 784
HID = 98
OUT = 49
LANE = 128                # lane-dense padded feature width for the hidden layer


def _leaky_relu(x):
    return jnp.where(x > 0, x, NEG_SLOPE * x)


def encoder_kernel(x_ref, w1_ref, b1_ref, w2_ref, b2_ref, o_ref):
    # x_ref : (TB, 784) f32         w1_ref: (784, 128) bf16   b1_ref: (1, 128) f32
    # w2_ref: (128, 128) bf16       b2_ref: (1, 128) f32      o_ref : (TB, 49) bf16
    # In-kernel f32 -> bf16 cast (VPU work, hidden under DMA/MXU).
    x = x_ref[...].astype(w1_ref.dtype)

    # fc1 + leaky_relu  (MXU matmul, f32 accumulate; bias/act in f32)
    h = jnp.dot(x, w1_ref[...], preferred_element_type=jnp.float32)
    h = _leaky_relu(h + b1_ref[...])

    # fc2 + leaky_relu  (re-cast hidden to bf16 for the MXU; padded lanes are 0,
    # and leaky_relu(0) == 0, so padding stays exact zero throughout)
    h = h.astype(w2_ref.dtype)
    z = jnp.dot(h, w2_ref[...], preferred_element_type=jnp.float32)
    z = _leaky_relu(z + b2_ref[...])

    # Store only the real 49 output features (masked vst; cost hidden, DMA-bound).
    o_ref[...] = z[:, :OUT].astype(o_ref.dtype)


def _round_up(n, m):
    return ((n + m - 1) // m) * m


def _default_tile_b():
    """Generation-aware batch tile: amortize ~0.35 µs/step overhead vs VMEM budget."""
    try:
        kind = jax.devices()[0].device_kind.lower()
    except Exception:
        return 1024
    if "v5" in kind:
        return 1024   # 16 MiB default scoped VMEM; f32 x tile x2 buffers ~6 MiB
    if "v6" in kind:
        return 2048   # ~15 MiB footprint, well under 32 MiB
    return 4096       # v7x+: 3.2 TB/s HBM -> step overhead dominant; ~30 MiB footprint


def prepack_params(params, compute_dtype=jnp.bfloat16):
    """One-time prepack: transpose, cast to bf16, zero-pad feature dims to 128 lanes.

    Do this once per set of weights (outside the per-forward path)."""
    w1, b1, w2, b2 = params
    w1_p = jnp.zeros((IN_FEATURES, LANE), compute_dtype).at[:, :HID].set(
        w1.T.astype(compute_dtype))                           # (784, 128)
    b1_p = jnp.zeros((1, LANE), jnp.float32).at[:, :HID].set(
        b1.astype(jnp.float32))                               # (1, 128)
    w2_p = jnp.zeros((LANE, LANE), compute_dtype).at[:HID, :OUT].set(
        w2.T.astype(compute_dtype))                           # (128, 128)
    b2_p = jnp.zeros((1, LANE), jnp.float32).at[:, :OUT].set(
        b2.astype(jnp.float32))                               # (1, 128)
    return w1_p, b1_p, w2_p, b2_p


def encoder_forward(x, packed_params, *, tile_b=None):
    """x: (B, 1, 28, 28) float32 NCHW.  Returns (B, 49) bfloat16.

    packed_params: output of `prepack_params`.
    """
    w1_p, b1_p, w2_p, b2_p = packed_params
    B = x.shape[0]
    x_flat = x.reshape(B, -1)                # f32, no copy/cast in the wrapper
    assert x_flat.shape[1] == IN_FEATURES

    if tile_b is None:
        tile_b = _default_tile_b()
    # Batch tile: multiple of 8 (sublane constraint), no larger than needed.
    tb = _round_up(min(tile_b, _round_up(B, 8)), 8)

    grid = (pl.cdiv(B, tb),)                 # ragged tail block handled by Pallas

    out = pl.pallas_call(
        encoder_kernel,
        out_shape=jax.ShapeDtypeStruct((B, OUT), jnp.bfloat16),
        grid=grid,
        in_specs=[
            pl.BlockSpec((tb, IN_FEATURES), lambda i: (i, 0)),    # x tile (streamed, f32)
            pl.BlockSpec((IN_FEATURES, LANE), lambda i: (0, 0)),  # w1 (VMEM-resident)
            pl.BlockSpec((1, LANE), lambda i: (0, 0)),            # b1 (resident)
            pl.BlockSpec((LANE, LANE), lambda i: (0, 0)),         # w2 (resident)
            pl.BlockSpec((1, LANE), lambda i: (0, 0)),            # b2 (resident)
        ],
        out_specs=pl.BlockSpec((tb, OUT), lambda i: (i, 0)),      # (B, 49) bf16, no slice
        compiler_params=pltpu.CompilerParams(
            dimension_semantics=("parallel",),
            vmem_limit_bytes=48 << 20,
        ),
    )(x_flat, w1_p, b1_p, w2_p, b2_p)

    return out


def init_params(key):
    """Deterministic init matching nn.Linear shapes (PyTorch-style uniform)."""
    k1, k2, k3, k4 = jax.random.split(key, 4)
    bound1 = 1.0 / jnp.sqrt(784.0)
    w1 = jax.random.uniform(k1, (98, 784), jnp.float32, -bound1, bound1)
    b1 = jax.random.uniform(k2, (98,), jnp.float32, -bound1, bound1)
    bound2 = 1.0 / jnp.sqrt(98.0)
    w2 = jax.random.uniform(k3, (49, 98), jnp.float32, -bound2, bound2)
    b2 = jax.random.uniform(k4, (49,), jnp.float32, -bound2, bound2)
    return w1, b1, w2, b2


def reference_forward(x, params):
    """Pure-JAX f32 reference of the PyTorch forward (HIGHEST matmul precision)."""
    w1, b1, w2, b2 = params
    xf = x.reshape(x.shape[0], -1)
    h = _leaky_relu(
        jnp.dot(xf, w1.T, precision=jax.lax.Precision.HIGHEST) + b1)
    z = _leaky_relu(
        jnp.dot(h, w2.T, precision=jax.lax.Precision.HIGHEST) + b2)
    return z


if __name__ == "__main__":
    key = jax.random.PRNGKey(0)
    kp, kx1, kx2 = jax.random.split(key, 3)
    params = init_params(kp)
    packed = prepack_params(params)   # one-time weight prepack

    # Test 1: tiny batch (single grid step, default generation-aware tile).
    B1 = 8
    x1 = jax.random.normal(kx1, (B1, 1, 28, 28), jnp.float32)
    out1 = jax.block_until_ready(encoder_forward(x1, packed))
    ref1 = reference_forward(x1, params)
    assert out1.shape == (B1, OUT), out1.shape
    assert out1.dtype == jnp.bfloat16, out1.dtype
    # bf16 inputs/weights/output with f32 accumulation -> loose tolerance vs f32 ref.
    assert jnp.allclose(out1.astype(jnp.float32), ref1, atol=4e-2, rtol=4e-2), \
        "mismatch vs reference (B=8)"

    # Test 2: multi-step grid with a ragged tail block (B=200, tile=64 -> 4 steps).
    B2 = 200
    x2 = jax.random.normal(kx2, (B2, 1, 28, 28), jnp.float32)
    out2 = jax.block_until_ready(encoder_forward(x2, packed, tile_b=64))
    ref2 = reference_forward(x2, params)
    assert out2.shape == (B2, OUT), out2.shape
    assert jnp.allclose(out2.astype(jnp.float32), ref2, atol=4e-2, rtol=4e-2), \
        "mismatch vs reference (B=200, ragged grid)"

    print("KERNEL_OK")
</pallas_src>

<mosaic_0001>
module attributes {stable_mosaic.version = 11 : i64} {
  func.func @encoder_kernel(%arg0: i32, %arg1: memref<8x784xf32, #tpu.memory_space<vmem>>, %arg2: memref<784x128xbf16, #tpu.memory_space<vmem>>, %arg3: memref<1x128xf32, #tpu.memory_space<vmem>>, %arg4: memref<128x128xbf16, #tpu.memory_space<vmem>>, %arg5: memref<1x128xf32, #tpu.memory_space<vmem>>, %arg6: memref<8x49xbf16, #tpu.memory_space<vmem>>) attributes {dimension_semantics = [#tpu.dimension_semantics<parallel>], iteration_bounds = array<i64: 1>, scalar_prefetch = 0 : i64, scratch_operands = 0 : i64, tpu.core_type = #tpu.core_type<tc>, window_params = [{transform_indices = @transform_0, window_bounds = array<i64: 8, 784>}, {pipeline_mode = #tpu.pipeline_mode<synchronous>, transform_indices = @transform_1, window_bounds = array<i64: 784, 128>}, {pipeline_mode = #tpu.pipeline_mode<synchronous>, transform_indices = @transform_2, window_bounds = array<i64: 1, 128>}, {pipeline_mode = #tpu.pipeline_mode<synchronous>, transform_indices = @transform_3, window_bounds = array<i64: 128, 128>}, {pipeline_mode = #tpu.pipeline_mode<synchronous>, transform_indices = @transform_4, window_bounds = array<i64: 1, 128>}, {transform_indices = @transform_5, window_bounds = array<i64: 8, 49>}]} {
    %c0 = arith.constant 0 : index
    %c0_0 = arith.constant 0 : index
    %0 = vector.load %arg1[%c0, %c0_0] : memref<8x784xf32, #tpu.memory_space<vmem>>, vector<8x784xf32>
    %1 = arith.truncf %0 : vector<8x784xf32> to vector<8x784xbf16>
    %c0_1 = arith.constant 0 : index
    %c0_2 = arith.constant 0 : index
    %2 = vector.load %arg2[%c0_1, %c0_2] : memref<784x128xbf16, #tpu.memory_space<vmem>>, vector<784x128xbf16>
    %cst = arith.constant dense<0.000000e+00> : vector<8x128xf32>
    %3 = tpu.matmul %1, %2, %cst {dimension_numbers = #tpu.dot_dimension_numbers<[1], [0], [0], [1], [0, 0, 1, 1], [], []>} : vector<8x784xbf16>, vector<784x128xbf16>, vector<8x128xf32> -> vector<8x128xf32>
    %c0_3 = arith.constant 0 : index
    %c0_4 = arith.constant 0 : index
    %4 = vector.load %arg3[%c0_3, %c0_4] : memref<1x128xf32, #tpu.memory_space<vmem>>, vector<1x128xf32>
    %5 = vector.broadcast %4 : vector<1x128xf32> to vector<8x128xf32>
    %6 = arith.addf %3, %5 : vector<8x128xf32>
    %cst_5 = arith.constant 0.000000e+00 : f32
    %7 = vector.broadcast %cst_5 : f32 to vector<8x128xf32>
    %8 = arith.cmpf ogt, %6, %7 : vector<8x128xf32>
    %cst_6 = arith.constant 0.00999999977 : f32
    %9 = vector.broadcast %cst_6 : f32 to vector<8x128xf32>
    %10 = arith.mulf %9, %6 : vector<8x128xf32>
    %11 = arith.select %8, %6, %10 : vector<8x128xi1>, vector<8x128xf32>
    %12 = arith.truncf %11 : vector<8x128xf32> to vector<8x128xbf16>
    %c0_7 = arith.constant 0 : index
    %c0_8 = arith.constant 0 : index
    %13 = vector.load %arg4[%c0_7, %c0_8] : memref<128x128xbf16, #tpu.memory_space<vmem>>, vector<128x128xbf16>
    %cst_9 = arith.constant dense<0.000000e+00> : vector<8x128xf32>
    %14 = tpu.matmul %12, %13, %cst_9 {dimension_numbers = #tpu.dot_dimension_numbers<[1], [0], [0], [1], [0, 0, 1, 1], [], []>} : vector<8x128xbf16>, vector<128x128xbf16>, vector<8x128xf32> -> vector<8x128xf32>
    %c0_10 = arith.constant 0 : index
    %c0_11 = arith.constant 0 : index
    %15 = vector.load %arg5[%c0_10, %c0_11] : memref<1x128xf32, #tpu.memory_space<vmem>>, vector<1x128xf32>
    %16 = vector.broadcast %15 : vector<1x128xf32> to vector<8x128xf32>
    %17 = arith.addf %14, %16 : vector<8x128xf32>
    %cst_12 = arith.constant 0.000000e+00 : f32
    %18 = vector.broadcast %cst_12 : f32 to vector<8x128xf32>
    %19 = arith.cmpf ogt, %17, %18 : vector<8x128xf32>
    %cst_13 = arith.constant 0.00999999977 : f32
    %20 = vector.broadcast %cst_13 : f32 to vector<8x128xf32>
    %21 = arith.mulf %20, %17 : vector<8x128xf32>
    %22 = arith.select %19, %17, %21 : vector<8x128xi1>, vector<8x128xf32>
    %23 = vector.extract_strided_slice %22 {offsets = [0, 0], sizes = [8, 49], strides = [1, 1]} : vector<8x128xf32> to vector<8x49xf32>
    %24 = arith.truncf %23 : vector<8x49xf32> to vector<8x49xbf16>
    %c0_14 = arith.constant 0 : index
    %c0_15 = arith.constant 0 : index
    %25 = vector.load %arg6[%c0_14, %c0_15] : memref<8x49xbf16, #tpu.memory_space<vmem>>, vector<8x49xbf16>
    tpu.vector_store %arg6[%c0_14, %c0_15], %24 {strides = array<i32>} : memref<8x49xbf16, #tpu.memory_space<vmem>>, vector<8x49xbf16>,
    return
  }
  func.func @transform_0(%arg0: i32) -> (i32, i32) {
    %c0_i32 = arith.constant 0 : i32
    %c0_i32_0 = arith.constant 0 : i32
    return %arg0, %c0_i32 : i32, i32
  }
  func.func @transform_1(%arg0: i32) -> (i32, i32) {
    %c0_i32 = arith.constant 0 : i32
    %c0_i32_0 = arith.constant 0 : i32
    %c0_i32_1 = arith.constant 0 : i32
    return %c0_i32, %c0_i32_0 : i32, i32
  }
  func.func @transform_2(%arg0: i32) -> (i32, i32) {
    %c0_i32 = arith.constant 0 : i32
    %c0_i32_0 = arith.constant 0 : i32
    %c0_i32_1 = arith.constant 0 : i32
    return %c0_i32, %c0_i32_0 : i32, i32
  }
  func.func @transform_3(%arg0: i32) -> (i32, i32) {
    %c0_i32 = arith.constant 0 : i32
    %c0_i32_0 = arith.constant 0 : i32
    %c0_i32_1 = arith.constant 0 : i32
    return %c0_i32, %c0_i32_0 : i32, i32
  }
  func.func @transform_4(%arg0: i32) -> (i32, i32) {
    %c0_i32 = arith.constant 0 : i32
    %c0_i32_0 = arith.constant 0 : i32
    %c0_i32_1 = arith.constant 0 : i32
    return %c0_i32, %c0_i32_0 : i32, i32
  }
  func.func @transform_5(%arg0: i32) -> (i32, i32) {
    %c0_i32 = arith.constant 0 : i32
    %c0_i32_0 = arith.constant 0 : i32
    return %arg0, %c0_i32 : i32, i32
  }
}

</mosaic_0001>

<bundles_post_ra>
// kernel: tpu_custom_call.1
= control target key start
LH: loop header
LB: loop body
LE: loop exit
PB: predicated region body
PF: predicated region fallthrough
CT: control target
= control target key end

     0   :  { %10 = vsyncpa [#allocation3], 0  ;;  %s1208_s0 = inlined_call_operand.hbm [shape: f32[8,784], index: 0, kind: input, shape index: {}]   ;;  %s1209_s1 = inlined_call_operand.hbm [shape: bf16[784,128], index: 1, kind: input, shape index: {}]   ;;  %s1210_s2 = inlined_call_operand.vmem [shape: f32[1,128], index: 2, kind: input, shape index: {}]   ;;  %s1211_s3 = inlined_call_operand.hbm [shape: bf16[128,128], index: 3, kind: input, shape index: {}]   ;;  %s1212_s4 = inlined_call_operand.vmem [shape: f32[1,128], index: 4, kind: input, shape index: {}]   ;;  %s1213_s5 = inlined_call_operand.hbm [shape: bf16[8,49], index: 5, kind: output, shape index: {}]  }
   0x1   :  { %11 = vsyncpa [#allocation6], 0 }
   0x2   :  { %12 = vsyncpa [#allocation4], 0  ;;  %s1097_s18 = smov [#allocation5]   ;;  %s1003_s22 = scalar_lea.hbm %s1209_s1, 6272 }
   0x3   :  { %s28_s19 = sshll.u32 %s1097_s18, 4  ;;  %p1004_p0 = scmp.ne.s32.totalorder %s1209_s1, %s1003_s22  ;;  %s29_s19 = int_to_ptr.vmem [resolvable:$true] %s28_s19 }
   0x4   :  { %p1007_p1 = scmp.lt.u32.totalorder %s1003_s22, %s1209_s1 }
   0x6   :  { %p1009_p2 = pnand %p1007_p1, %p1004_p0 }
   0x8   :  { %1012 = shalt.err (!%p1009_p2)
}
   0x9   :  { %s1013_s27 = scalar_lea.vmem %s29_s19, 6272  ;;  %p1018_p4 = scmp.lt.s32.totalorder %s29_s19, %s29_s19 }
   0xa   :  { %p1014_p3 = scmp.ne.s32.totalorder %s29_s19, %s1013_s27  ;;  %p1019_p5 = scmp.lt.s32.totalorder %s1013_s27, %s1013_s27 }
   0xc   :  { %p1020_p6 = por %p1019_p5, %p1018_p4 }
   0xe   :  { %p1021_p7 = pnand %p1020_p6, %p1014_p3 }
  0x10   :  { %1024 = shalt.err (!%p1021_p7)
}
  0x11   :  { %s1098_s28 = smov 64   ;;  %s1099_s29 = smov 4  }
  0x12   :  { %34 = dma.hbm_to_vmem [thread:$0]  %s1209_s1, 6272, %s29_s19, [#allocation6], %s1098_s28, %s1098_s28, %s1099_s29  }
  0x13   :  { %s1100_s7 = smov [#allocation2]   ;;  %s1101_s9 = smov [#allocation7]  }
  0x14   :  { %s19_s8 = sshll.u32 %s1100_s7, 4  ;;  %s42_s10 = sshll.u32 %s1101_s9, 4  ;;  %s20_s8 = int_to_ptr.vmem [resolvable:$true] %s19_s8  ;;  %s43_s10 = int_to_ptr.vmem [resolvable:$true] %s42_s10 }
  0x15   :  { %s1025_s13 = scalar_lea.hbm %s1208_s0, 896 }
  0x16   :  { %p1026_p8 = scmp.ne.s32.totalorder %s1208_s0, %s1025_s13  ;;  %p1029_p9 = scmp.lt.u32.totalorder %s1025_s13, %s1208_s0 }
  0x18   :  { %p1031_p10 = pnand %p1029_p9, %p1026_p8 }
  0x1a   :  { %1034 = shalt.err (!%p1031_p10)
}
  0x1b   :  { %s1035_s1 = scalar_lea.vmem %s20_s8, 896  ;;  %p1040_p12 = scmp.lt.s32.totalorder %s20_s8, %s20_s8 }
  0x1c   :  { %p1036_p11 = scmp.ne.s32.totalorder %s20_s8, %s1035_s1  ;;  %p1041_p13 = scmp.lt.s32.totalorder %s1035_s1, %s1035_s1 }
  0x1e   :  { %p1042_p0 = por %p1041_p13, %p1040_p12 }
  0x20   :  { %p1043_p1 = pnand %p1042_p0, %p1036_p11 }
  0x22   :  { %1046 = shalt.err (!%p1043_p1)
}
  0x23   :  { %22 = dma.hbm_to_vmem [thread:$0]  %s1208_s0, 896, %s20_s8, [#allocation3]  }
  0x24   :  { %s1047_s22 = scalar_lea.hbm %s1211_s3, 1024 }
  0x25   :  { %p1048_p2 = scmp.ne.s32.totalorder %s1211_s3, %s1047_s22  ;;  %p1051_p3 = scmp.lt.u32.totalorder %s1047_s22, %s1211_s3 }
  0x27   :  { %p1053_p4 = pnand %p1051_p3, %p1048_p2 }
  0x29   :  { %1056 = shalt.err (!%p1053_p4)
}
  0x2a   :  { %s1057_s27 = scalar_lea.vmem %s43_s10, 1024  ;;  %p1062_p6 = scmp.lt.s32.totalorder %s43_s10, %s43_s10 }
  0x2b   :  { %p1058_p5 = scmp.ne.s32.totalorder %s43_s10, %s1057_s27  ;;  %p1063_p7 = scmp.lt.s32.totalorder %s1057_s27, %s1057_s27 }
  0x2d   :  { %p1064_p8 = por %p1063_p7, %p1062_p6 }
  0x2f   :  { %p1065_p9 = pnand %p1064_p8, %p1058_p5 }
  0x31   :  { %1068 = shalt.err (!%p1065_p9)
}
  0x32   :  { %48 = dma.hbm_to_vmem [thread:$0]  %s1211_s3, 1024, %s43_s10, [#allocation6], %s1098_s28, %s1098_s28, %s1099_s29  }
  0x33   :  { %1091 = dma.done.wait [#allocation3], 896  }
  0x34   :  { %1092 = vsyncadd [#allocation3], 4294966400 }
  0x35   :  { %1093 = dma.done.wait [#allocation6], 7296  }
  0x36   :  { %1094 = vsyncadd [#allocation6], 4294960000  ;;  %v946_v0 = vld [vmem:[#allocation5 + $0x40] sm:$0xff]   ;;  %v950_v4 = vld [vmem:[#allocation5 + $0x48] sm:$0xff]   ;;  %v1102_v44 = vmov 0.0   ;;  %vm1103_vm0 = vmmov 0  }
  0x37   :  { %v947_v1 = vld [vmem:[#allocation5] sm:$0xff]   ;;  %835 = vmatprep.subr.bf16.mxu0 %v946_v0  ;;  %v951_v5 = vld [vmem:[#allocation5 + $0x8] sm:$0xff]   ;;  %v954_v8 = vld [vmem:[#allocation5 + $0x50] sm:$0xff]   ;;  %vm474_vm1 = vcmask 130048   ;;  %s1104_s6 = smov [#allocation8]   ;;  %vm757_vm4 = vcmask 396288  }
  0x38   :  { %v948_v2 = vld [vmem:[#allocation5 + $0xc0] sm:$0xff]   ;;  %836 = vmatpush3.bf16.msra.mxu0 %v947_v1  ;;  %v952_v6 = vld [vmem:[#allocation5 + $0xc8] sm:$0xff]   ;;  %v955_v9 = vld [vmem:[#allocation5 + $0x10] sm:$0xff]   ;;  %s765_s7 = sshll.u32 %s1104_s6, 4  ;;  %s766_s7 = int_to_ptr.vmem [resolvable:$true] %s765_s7 }
  0x39   :  { %v949_v3 = vld [vmem:[#allocation5 + $0x80] sm:$0xff]   ;;  %857 = vmatprep.subr.bf16.mxu1 %v948_v2  ;;  %837 = vmatprep.subr.bf16.mxu0 %v950_v4  ;;  %v953_v7 = vld [vmem:[#allocation5 + $0x88] sm:$0xff]   ;;  %v956_v10 = vld [vmem:[#allocation5 + $0xd0] sm:$0xff]   ;;  %s1069_s8 = scalar_lea.vmem %s766_s7, 64  ;;  %p1074_p11 = scmp.lt.s32.totalorder %s766_s7, %s766_s7 }
  0x3a   :  { %858 = vmatpush3.bf16.msra.mxu1 %v949_v3  ;;  %v957_v11 = vld [vmem:[#allocation5 + $0x90] sm:$0xff]   ;;  %v958_v12 = vld [vmem:[#allocation5 + $0x58] sm:$0xff]   ;;  %v962_v16 = vld [vmem:[#allocation5 + $0x60] sm:$0xff]   ;;  %p1070_p10 = scmp.ne.s32.totalorder %s766_s7, %s1069_s8  ;;  %p1075_p12 = scmp.lt.s32.totalorder %s1069_s8, %s1069_s8 }
  0x3b   :  { %859 = vmatprep.subr.bf16.mxu1 %v952_v6  ;;  %v959_v13 = vld [vmem:[#allocation5 + $0x18] sm:$0xff]   ;;  %v963_v17 = vld [vmem:[#allocation5 + $0x20] sm:$0xff]   ;;  %v966_v20 = vld [vmem:[#allocation5 + $0x68] sm:$0xff]  }
  0x3c   :  { %838 = vmatpush3.bf16.msra.mxu0 %v951_v5  ;;  %v960_v14 = vld [vmem:[#allocation5 + $0xd8] sm:$0xff]   ;;  %v964_v18 = vld [vmem:[#allocation5 + $0xe0] sm:$0xff]   ;;  %v967_v21 = vld [vmem:[#allocation5 + $0x28] sm:$0xff]   ;;  %p1076_p13 = por %p1075_p12, %p1074_p11 }
  0x3d   :  { %839 = vmatprep.subr.bf16.mxu0 %v954_v8  ;;  %v961_v15 = vld [vmem:[#allocation5 + $0x98] sm:$0xff]   ;;  %v965_v19 = vld [vmem:[#allocation5 + $0xa0] sm:$0xff]   ;;  %v968_v22 = vld [vmem:[#allocation5 + $0xe8] sm:$0xff]  }
  0x3e   :  { %860 = vmatpush3.bf16.msra.mxu1 %v953_v7  ;;  %v969_v23 = vld [vmem:[#allocation5 + $0xa8] sm:$0xff]   ;;  %v970_v24 = vld [vmem:[#allocation5 + $0x70] sm:$0xff]   ;;  %v974_v28 = vld [vmem:[#allocation5 + $0x78] sm:$0xff]   ;;  %p1077_p0 = pnand %p1076_p13, %p1070_p10 }
  0x3f   :  { %861 = vmatprep.subr.bf16.mxu1 %v956_v10  ;;  %v971_v25 = vld [vmem:[#allocation5 + $0x30] sm:$0xff]   ;;  %v975_v29 = vld [vmem:[#allocation5 + $0x38] sm:$0xff]   ;;  %v61_v34 = vld [vmem:[#allocation2] sm:$0xff] }
  0x40   :  { %840 = vmatpush3.bf16.msra.mxu0 %v955_v9  ;;  %v972_v26 = vld [vmem:[#allocation5 + $0xf0] sm:$0xff]   ;;  %v976_v30 = vld [vmem:[#allocation5 + $0xf8] sm:$0xff]   ;;  %v68_v35 = vpack.c.bf16 %v61_v34, %v61_v34  ;;  %v978_v36 = vld [vmem:[#allocation5 + $0x140] sm:$0xff]  }
  0x41   :  { %841 = vmatprep.subr.bf16.mxu0 %v958_v12  ;;  %v973_v27 = vld [vmem:[#allocation5 + $0xb0] sm:$0xff]   ;;  %v977_v33 = vld [vmem:[#allocation5 + $0xb8] sm:$0xff]   ;;  %v64_v37 = vld [vmem:[#allocation2 + $0x18] sm:$0xff] }
  0x42   :  { %862 = vmatpush3.bf16.msra.mxu1 %v957_v11  ;;  %v62_v31 = vld [vmem:[#allocation2 + $0x8] sm:$0xff]  ;;  %v71_v38 = vpack.c.bf16 %v64_v37, %v64_v37  ;;  %v979_v39 = vld [vmem:[#allocation5 + $0x100] sm:$0xff]   ;;  %v63_v40 = vld [vmem:[#allocation2 + $0x10] sm:$0xff] }
  0x43   :  { %863 = vmatprep.subr.bf16.mxu1 %v960_v14  ;;  %v69_v32 = vpack.c.bf16 %v62_v31, %v62_v31  ;;  %v70_v41 = vpack.c.bf16 %v63_v40, %v63_v40  ;;  %v980_v42 = vld [vmem:[#allocation5 + $0x148] sm:$0xff]   ;;  %v982_v45 = vld [vmem:[#allocation5 + $0x150] sm:$0xff]   ;;  %v984_v47 = vld [vmem:[#allocation5 + $0x158] sm:$0xff]  }
  0x44   :  { %842 = vmatpush3.bf16.msra.mxu0 %v959_v13  ;;  %550 = vmatprep.mubr.bf16.mxu1 %v71_v38  ;;  %v981_v43 = vld [vmem:[#allocation5 + $0x108] sm:$0xff]   ;;  %v983_v46 = vld [vmem:[#allocation5 + $0x110] sm:$0xff]   ;;  %v985_v48 = vld [vmem:[#allocation5 + $0x118] sm:$0xff]  }
  0x45   :  { %843 = vmatprep.subr.bf16.mxu0 %v962_v16  ;;  %510 = vmatprep.mubr.bf16.mxu0 %v69_v32  ;;  %v986_v49 = vld [vmem:[#allocation5 + $0x160] sm:$0xff]   ;;  %v988_v51 = vld [vmem:[#allocation5 + $0x168] sm:$0xff]   ;;  %v66_v54 = vld [vmem:[#allocation2 + $0x28] sm:$0xff] }
  0x46   :  { %864 = vmatpush3.bf16.msra.mxu1 %v961_v15  ;;  %v987_v50 = vld [vmem:[#allocation5 + $0x120] sm:$0xff]   ;;  %v989_v52 = vld [vmem:[#allocation5 + $0x128] sm:$0xff]   ;;  %v990_v55 = vld [vmem:[#allocation5 + $0x170] sm:$0xff]   ;;  %v73_v56 = vpack.c.bf16 %v66_v54, %v66_v54 }
  0x47   :  { %865 = vmatprep.subr.bf16.mxu1 %v964_v18  ;;  %v994_v53 = vld [vmem:[#allocation5 + $0x180] sm:$0xff]   ;;  %v67_v57 = vld [vmem:[#allocation2 + $0x30] sm:$0xff]  ;;  %v991_v59 = vld [vmem:[#allocation5 + $0x130] sm:$0xff]  }
  0x48   :  { %844 = vmatpush3.bf16.msra.mxu0 %v963_v17  ;;  %v74_v58 = vpack.c.bf16 %v67_v57, %v67_v57  ;;  %v992_v60 = vld [vmem:[#allocation5 + $0x178] sm:$0xff]   ;;  %v65_v62 = vld [vmem:[#allocation2 + $0x20] sm:$0xff]  ;;  %v996_v1 = vld [vmem:[#allocation7 + $0x8] sm:$0xff]  }
  0x49   :  { %845 = vmatprep.subr.bf16.mxu0 %v966_v20  ;;  %v993_v61 = vld [vmem:[#allocation5 + $0x138] sm:$0xff]   ;;  %v72_v63 = vpack.c.bf16 %v65_v62, %v65_v62  ;;  %v995_v0 = vld [vmem:[#allocation7] sm:$0xff]   ;;  %v998_v3 = vld [vmem:[#allocation7 + $0x18] sm:$0xff]  }
  0x4a   :  { %866 = vmatpush3.bf16.msra.mxu1 %v965_v19  ;;  %v997_v2 = vld [vmem:[#allocation7 + $0x10] sm:$0xff]   ;;  %v999_v4 = vld [vmem:[#allocation7 + $0x20] sm:$0xff]   ;;  %v1000_v5 = vld [vmem:[#allocation7 + $0x28] sm:$0xff]  }
  0x4b   :  { %867 = vmatprep.subr.bf16.mxu1 %v968_v22  ;;  %v1001_v6 = vld [vmem:[#allocation7 + $0x30] sm:$0xff]   ;;  %v1002_v7 = vld [vmem:[#allocation7 + $0x38] sm:$0xff]   ;;  %v775_v9 = vld [vmem:[%s1210_s2] ss:$0 sm:$0xff] }
  0x4c   :  { %846 = vmatpush3.bf16.msra.mxu0 %v967_v21 }
  0x4d   :  { %847 = vmatprep.subr.bf16.mxu0 %v970_v24 }
  0x4e   :  { %868 = vmatpush3.bf16.msra.mxu1 %v969_v23 }
  0x4f   :  { %869 = vmatprep.subr.bf16.mxu1 %v972_v26 }
  0x50   :  { %848 = vmatpush3.bf16.msra.mxu0 %v971_v25 }
  0x51   :  { %849 = vmatprep.subr.bf16.mxu0 %v974_v28 }
  0x52   :  { %870 = vmatpush3.bf16.msra.mxu1 %v973_v27 }
  0x53   :  { %871 = vmatprep.subr.bf16.mxu1 %v976_v30 }
  0x54   :  { %850 = vmatpush3.bf16.msra.mxu0 %v975_v29 }
  0x55   :  { %879 = vmatprep.subr.bf16.mxu0 %v978_v36 }
  0x56   :  { %872 = vmatpush3.bf16.msra.mxu1 %v977_v33 }
  0x57   :  { %511 = vmatmul.mubr.bf16.vlgmr.msra.gmra.mrb[0].mxu0 %v68_v35  ;;  %912 = vmatprep.subr.bf16.mxu1 %v1102_v44  ;;  %v826_v35 = vld [vmem:[%s1212_s4] ss:$0 sm:$0xff] }
  0x58   :  { %880 = vmatpush3.bf16.msra.mxu0 %v979_v39  ;;  %590 = vmatprep.mubr.bf16.mxu0 %v73_v56 }
  0x59   :  { %551 = vmatmul.mubr.bf16.vlgmr.msra.gmra.mrb[0].mxu1 %v70_v41  ;;  %881 = vmatprep.subr.bf16.mxu0 %v980_v42 }
  0x5a   :  { %914 = vmatprep.mubr.msk.bf16.mxu1 %vm1103_vm0, %v1102_v44  ;;  %913 = vmatpush3.bf16.msra.mxu1 %v994_v53 }
  0x5b   :  { %918 = vmatprep.subr.bf16.mxu1 %v1102_v44 }
  0x5c   :  { %882 = vmatpush3.bf16.msra.mxu0 %v981_v43 }
  0x5d   :  { %883 = vmatprep.subr.bf16.mxu0 %v982_v45 }
  0x60   :  { %884 = vmatpush3.bf16.msra.mxu0 %v983_v46 }
  0x61   :  { %885 = vmatprep.subr.bf16.mxu0 %v984_v47  ;;  %915 = vmatmul.mubr.msk.bf16.vlgmr.msra.gmra.mrb[4].mxu1 %vm474_vm1, %v74_v58 }
  0x62   :  { %934 = vmatprep.mubr.msk.bf16.mxu1 %vm1103_vm0, %v1102_v44  ;;  %919 = vmatpush3.bf16.msra.mxu1 %v995_v0 }
  0x63   :  { %920 = vmatprep.subr.bf16.mxu1 %v1102_v44 }
  0x64   :  { %886 = vmatpush3.bf16.msra.mxu0 %v985_v48 }
  0x65   :  { %887 = vmatprep.subr.bf16.mxu0 %v986_v49 }
  0x66   :  { %921 = vmatpush3.bf16.msra.mxu1 %v996_v1 }
  0x67   :  { %922 = vmatprep.subr.bf16.mxu1 %v1102_v44 }
  0x68   :  { %888 = vmatpush3.bf16.msra.mxu0 %v987_v50 }
  0x69   :  { %889 = vmatprep.subr.bf16.mxu0 %v988_v51 }
  0x6a   :  { %923 = vmatpush3.bf16.msra.mxu1 %v997_v2 }
  0x6b   :  { %924 = vmatprep.subr.bf16.mxu1 %v1102_v44 }
  0x6c   :  { %890 = vmatpush3.bf16.msra.mxu0 %v989_v52 }
  0x6d   :  { %891 = vmatprep.subr.bf16.mxu0 %v990_v55 }
  0x6e   :  { %925 = vmatpush3.bf16.msra.mxu1 %v998_v3 }
  0x6f   :  { %926 = vmatprep.subr.bf16.mxu1 %v1102_v44 }
  0x70   :  { %892 = vmatpush3.bf16.msra.mxu0 %v991_v59 }
  0x71   :  { %893 = vmatprep.subr.bf16.mxu0 %v992_v60 }
  0x72   :  { %927 = vmatpush3.bf16.msra.mxu1 %v999_v4 }
  0x73   :  { %928 = vmatprep.subr.bf16.mxu1 %v1102_v44 }
  0x74   :  { %894 = vmatpush3.bf16.msra.mxu0 %v993_v61 }
  0x76   :  { %929 = vmatpush3.bf16.msra.mxu1 %v1000_v5 }
  0x77   :  { %591 = vmatmul.mubr.bf16.vlgmr.msra.gmra.mrb[4].mxu0 %v72_v63  ;;  %930 = vmatprep.subr.bf16.mxu1 %v1102_v44 }
  0x7a   :  { %931 = vmatpush3.bf16.msra.mxu1 %v1001_v6 }
  0x7b   :  { %932 = vmatprep.subr.bf16.mxu1 %v1102_v44 }
  0x7e   :  { %933 = vmatpush3.bf16.msra.mxu1 %v1002_v7 }
 0x12a   :  { %v851_v8 = vpop.f32.mrb[0].mxu0 }
 0x12b   :  { %v852_v10 = vpop.f32.mrb[1].mxu0 }
 0x12c   :  { %v853_v11 = vadd.f32 %v852_v10, %v851_v8  ;;  %v854_v12 = vpop.f32.mrb[2].mxu0  ;;  %v873_v13 = vpop.f32.mrb[0].mxu1 }
 0x12d   :  { %v855_v14 = vpop.f32.mrb[3].mxu0  ;;  %v874_v16 = vpop.f32.mrb[1].mxu1 }
 0x12e   :  { %v513_v15 = vadd.f32 %v853_v11, %v775_v9  ;;  %v875_v17 = vadd.f32 %v874_v16, %v873_v13  ;;  %v876_v18 = vpop.f32.mrb[2].mxu1 }
 0x12f   :  { %v877_v19 = vpop.f32.mrb[3].mxu1 }
 0x130   :  { %v553_v20 = vadd.f32 %v875_v17, %v513_v15 }
 0x134   :  { %v632_v21 = vpop.f32.mrb[4].mxu1 }
 0x135   :  { %v916_v22 = vpop.f32.mrb[5].mxu1 }
 0x136   :  { %v635_v23 = vpop.f32.mrb[6].mxu1 }
 0x137   :  { %v917_v24 = vpop.f32.mrb[7].mxu1 }
 0x14a   :  { %v895_v25 = vpop.f32.mrb[4].mxu0 }
 0x14b   :  { %v896_v26 = vpop.f32.mrb[5].mxu0 }
 0x14c   :  { %v897_v27 = vadd.f32 %v896_v26, %v895_v25  ;;  %v898_v28 = vpop.f32.mrb[6].mxu0 }
 0x14d   :  { %v899_v29 = vpop.f32.mrb[7].mxu0 }
 0x14e   :  { %v593_v30 = vadd.f32 %v897_v27, %v553_v20 }
 0x150   :  { %v633_v31 = vadd.f32 %v632_v21, %v593_v30 }
 0x152   :  { %vm638_vm2 = vcmp.gt.f32.partialorder %v633_v31, 0.0  ;;  %v639_v32 = vmul.f32 0.01, %v633_v31 }
 0x154   :  { %v640_v33 = vsel %vm638_vm2, %v633_v31, %v639_v32 }
 0x155   :  { %v641_v34 = vpack.c.bf16 %v640_v33, %v640_v33 }
 0x157   :  { %935 = vmatmul.mubr.bf16.vlgmr.msra.gmra.mrb[8].mxu1 %v641_v34 }
 0x22a   :  { %v747_v36 = vpop.f32.mrb[8].mxu1 }
 0x22b   :  { %v748_v37 = vadd.f32 %v826_v35, %v747_v36  ;;  %v936_v38 = vpop.f32.mrb[9].mxu1 }
 0x22c   :  { %v750_v39 = vpop.f32.mrb[10].mxu1 }
 0x22d   :  { %vm753_vm3 = vcmp.gt.f32.partialorder %v748_v37, 0.0  ;;  %v754_v40 = vmul.f32 0.01, %v748_v37  ;;  %v937_v41 = vpop.f32.mrb[11].mxu1 }
 0x22f   :  { %v755_v42 = vsel %vm753_vm3, %v748_v37, %v754_v40 }
 0x230   :  { %v756_v43 = vpack.c.bf16 %v755_v42, %v755_v42 }
 0x232   :  { %758 = vst.msk [vmem:[#allocation8] sm:$0xf] %vm757_vm4, %v756_v43 }
 0x233   :  { %1080 = shalt.err (!%p1077_p0)
}
 0x234   :  { %s1081_s10 = scalar_lea.hbm %s1213_s5, 64 }
 0x235   :  { %p1082_p1 = scmp.ne.s32.totalorder %s1213_s5, %s1081_s10  ;;  %p1085_p2 = scmp.lt.u32.totalorder %s1081_s10, %s1213_s5 }
 0x237   :  { %p1087_p3 = pnand %p1085_p2, %p1082_p1 }
 0x239   :  { %1090 = shalt.err (!%p1087_p3)
}
 0x23a   :  { %768 = dma.vmem_to_hbm [thread:$0]  %s766_s7, 64, %s1213_s5, [#allocation4]  }
 0x23b   :  { %1095 = dma.done.wait [#allocation4], 64  }
 0x23c   :  { %1096 = vsyncadd [#allocation4], 4294967232 }
 0x23d   :  { %772 = vsyncpa [#allocation3], 1 }
 0x23e   :  { %773 = vsyncpa [#allocation6], 1 }
 0x23f   :  { %774 = vsyncpa [#allocation4], 1 }

</bundles_post_ra>
